<compile_context>
chip_gen: v6e
topology: v6e:2x2x1
jax: 0.10.0
libtpu: 0.0.40
codegen_flags: <defaults>
</compile_context>

<pallas_src>
import numpy as np
import jax
import jax.numpy as jnp
from jax import lax
from jax.experimental import pallas as pl
from jax.experimental.pallas import tpu as pltpu


def _round_up(x, m):
    return (x + m - 1) // m * m


def ddpg_policy_kernel(x_ref, w1_ref, b1_ref, w2_ref, b2_ref, w3_ref, b3_ref, o_ref):
    """Fused 3-layer MLP on one batch tile.

    x tile is the natural [TB, S] layout (no host-side transpose).  The first
    matmul contracts the S axes of W1 [H1, S] and x [TB, S], so Mosaic does the
    relayout on-chip and every matmul runs with batch on the lane axis:

        h1  = relu(W1 @ x^T + b1)  -> [H1, TB]
        h2  = relu(W2 @ h1  + b2)  -> [H2, TB]
        out = tanh(W3 @ h2  + b3)  -> [A,  TB]   (lane-dense store, TB % 128 == 0)
    """
    cdt = w1_ref.dtype                      # MXU dtype (f32, or bf16 by default)
    x = x_ref[...].astype(cdt)              # stream x at its stored dtype; cast on-chip
    h1 = lax.dot_general(w1_ref[...], x, (((1,), (1,)), ((), ())),
                         preferred_element_type=jnp.float32) + b1_ref[...]
    h1 = jnp.maximum(h1, 0.0).astype(cdt)
    h2 = jnp.dot(w2_ref[...], h1, preferred_element_type=jnp.float32) + b2_ref[...]
    h2 = jnp.maximum(h2, 0.0).astype(cdt)
    h3 = jnp.dot(w3_ref[...], h2, preferred_element_type=jnp.float32) + b3_ref[...]
    o_ref[...] = jnp.tanh(h3)               # EUP tanh on the f32 accumulator


def ddpg_policy_forward(state, params, *, compute_dtype=jnp.bfloat16, tile_b=8192,
                        dimension_semantics=("parallel",), transposed_output=False):
    """state: [B, state_size] -> actions [B, action_size] (or [A, B] if transposed_output)."""
    w1, b1, w2, b2, w3, b3 = params
    B, S = state.shape
    H1 = w1.shape[0]
    H2 = w2.shape[0]
    A = w3.shape[0]

    # Batch tile: multiple of 128 (lane width).  Clamp to the 128-rounded batch
    # so small batches are one grid step; cap at 16384 so all VMEM temporaries
    # (h1/h2 f32 slabs + bf16 copies + double-buffered x/out tiles) stay well
    # under the 32 MiB scoped limit requested below (safe incl. v7x 64 MiB VMEM).
    tb = min(int(tile_b), _round_up(B, 128), 16384)
    tb = max(128, _round_up(tb, 128))
    grid = (pl.cdiv(B, tb),)   # no batch padding: last partial tile is edge-masked

    w1c = w1.astype(compute_dtype)
    w2c = w2.astype(compute_dtype)
    w3c = w3.astype(compute_dtype)
    b1c = b1.reshape(H1, 1).astype(jnp.float32)
    b2c = b2.reshape(H2, 1).astype(jnp.float32)
    b3c = b3.reshape(A, 1).astype(jnp.float32)

    x_item = jnp.dtype(state.dtype).itemsize
    w_item = jnp.dtype(compute_dtype).itemsize
    cost = pl.CostEstimate(
        flops=2 * B * (S * H1 + H1 * H2 + H2 * A),
        transcendentals=B * A,
        bytes_accessed=int(
            B * S * x_item
            + (w1c.size + w2c.size + w3c.size) * w_item
            + (H1 + H2 + A) * 4
            + A * B * 4
        ),
    )

    batch_tile_x = lambda i: (i, 0)     # x marches down the batch rows
    batch_tile_o = lambda i: (0, i)     # out marches along the batch lanes
    resident = lambda i: (0, 0)         # weights & biases stay VMEM-resident

    outT = pl.pallas_call(
        ddpg_policy_kernel,
        out_shape=jax.ShapeDtypeStruct((A, B), jnp.float32),
        grid=grid,
        in_specs=[
            pl.BlockSpec((tb, S), batch_tile_x),
            pl.BlockSpec((H1, S), resident),
            pl.BlockSpec((H1, 1), resident),
            pl.BlockSpec((H2, H1), resident),
            pl.BlockSpec((H2, 1), resident),
            pl.BlockSpec((A, H2), resident),
            pl.BlockSpec((A, 1), resident),
        ],
        out_specs=pl.BlockSpec((A, tb), batch_tile_o),
        compiler_params=pltpu.CompilerParams(
            dimension_semantics=tuple(dimension_semantics),
            vmem_limit_bytes=32 * 1024 * 1024,
        ),
        cost_estimate=cost,
    )(state, w1c, b1c, w2c, b2c, w3c, b3c)

    if transposed_output:
        return outT           # [A, B]: skips the (tiny) final relayout entirely
    return outT.T             # [B, A]: PyTorch forward semantics


def init_params(key, state_size, action_size, H1=64, H2=64):
    """Mirror the PyTorch module's init.

    Weights are kept in PyTorch's [out_features, in_features] layout (exactly
    what the kernel wants).  init_fan_in uses weight.shape[0] (= out_features)
    — that quirk is reproduced on purpose.  Biases keep nn.Linear's default
    uniform(-1/sqrt(in_f), 1/sqrt(in_f)).
    """
    keys = jax.random.split(key, 6)

    def u(k, shape, lo, hi):
        return jax.random.uniform(k, shape, jnp.float32, lo, hi)

    w1 = u(keys[0], (H1, state_size), -1.0 / np.sqrt(H1), 1.0 / np.sqrt(H1))
    w2 = u(keys[1], (H2, H1), -1.0 / np.sqrt(H2), 1.0 / np.sqrt(H2))
    w3 = u(keys[2], (action_size, H2), -0.003, 0.003)

    b1 = u(keys[3], (H1,), -1.0 / np.sqrt(state_size), 1.0 / np.sqrt(state_size))
    b2 = u(keys[4], (H2,), -1.0 / np.sqrt(H1), 1.0 / np.sqrt(H1))
    b3 = u(keys[5], (action_size,), -1.0 / np.sqrt(H2), 1.0 / np.sqrt(H2))
    return (w1, b1, w2, b2, w3, b3)


def reference_forward(state, params):
    w1, b1, w2, b2, w3, b3 = params
    h1 = jnp.maximum(state @ w1.T + b1, 0.0)
    h2 = jnp.maximum(h1 @ w2.T + b2, 0.0)
    return jnp.tanh(h2 @ w3.T + b3)


if __name__ == "__main__":
    state_size, action_size, H1, H2 = 16, 4, 64, 64
    key = jax.random.PRNGKey(0)
    k_param, k_state1, k_state2 = jax.random.split(key, 3)
    params = init_params(k_param, state_size, action_size, H1, H2)

    # 1) Small batch, f32 compute: tight match against the JAX reference.
    state = jax.random.normal(k_state1, (8, state_size), jnp.float32)
    out = jax.block_until_ready(
        ddpg_policy_forward(state, params, compute_dtype=jnp.float32))
    ref = reference_forward(state, params)
    assert out.shape == (8, action_size)
    np.testing.assert_allclose(np.asarray(out), np.asarray(ref), rtol=2e-5, atol=2e-5)

    # 2) Multi-tile grid with a partial (edge-masked) last tile, f32 compute.
    state2 = jax.random.normal(k_state2, (300, state_size), jnp.float32)
    out2 = jax.block_until_ready(
        ddpg_policy_forward(state2, params, compute_dtype=jnp.float32, tile_b=128))
    ref2 = reference_forward(state2, params)
    np.testing.assert_allclose(np.asarray(out2), np.asarray(ref2), rtol=2e-5, atol=2e-5)

    # 3) Default bf16 MXU path (f32 state streamed from HBM, cast on-chip).
    out3 = jax.block_until_ready(ddpg_policy_forward(state2, params))
    np.testing.assert_allclose(np.asarray(out3), np.asarray(ref2), rtol=0, atol=5e-2)

    # 4) bf16 streaming of x (caller supplies bf16 state -> half the HBM read).
    out4 = jax.block_until_ready(
        ddpg_policy_forward(state2.astype(jnp.bfloat16), params))
    np.testing.assert_allclose(np.asarray(out4), np.asarray(ref2), rtol=0, atol=5e-2)

    print("KERNEL_OK")
</pallas_src>

<mosaic_0001>
module attributes {stable_mosaic.version = 11 : i64} {
  func.func @ddpg_policy_kernel(%arg0: i32, %arg1: memref<128x16xf32, #tpu.memory_space<vmem>>, %arg2: memref<64x16xf32, #tpu.memory_space<vmem>>, %arg3: memref<64x1xf32, #tpu.memory_space<vmem>>, %arg4: memref<64x64xf32, #tpu.memory_space<vmem>>, %arg5: memref<64x1xf32, #tpu.memory_space<vmem>>, %arg6: memref<4x64xf32, #tpu.memory_space<vmem>>, %arg7: memref<4x1xf32, #tpu.memory_space<vmem>>, %arg8: memref<4x128xf32, #tpu.memory_space<vmem>>) attributes {dimension_semantics = [#tpu.dimension_semantics<parallel>], iteration_bounds = array<i64: 1>, scalar_prefetch = 0 : i64, scratch_operands = 0 : i64, tpu.core_type = #tpu.core_type<tc>, window_params = [{transform_indices = @transform_0, window_bounds = array<i64: 128, 16>}, {pipeline_mode = #tpu.pipeline_mode<synchronous>, transform_indices = @transform_1, window_bounds = array<i64: 64, 16>}, {pipeline_mode = #tpu.pipeline_mode<synchronous>, transform_indices = @transform_2, window_bounds = array<i64: 64, 1>}, {pipeline_mode = #tpu.pipeline_mode<synchronous>, transform_indices = @transform_3, window_bounds = array<i64: 64, 64>}, {pipeline_mode = #tpu.pipeline_mode<synchronous>, transform_indices = @transform_4, window_bounds = array<i64: 64, 1>}, {pipeline_mode = #tpu.pipeline_mode<synchronous>, transform_indices = @transform_5, window_bounds = array<i64: 4, 64>}, {pipeline_mode = #tpu.pipeline_mode<synchronous>, transform_indices = @transform_6, window_bounds = array<i64: 4, 1>}, {transform_indices = @transform_7, window_bounds = array<i64: 4, 128>}]} {
    %c0 = arith.constant 0 : index
    %c0_0 = arith.constant 0 : index
    %0 = vector.load %arg1[%c0, %c0_0] : memref<128x16xf32, #tpu.memory_space<vmem>>, vector<128x16xf32>
    %c0_1 = arith.constant 0 : index
    %c0_2 = arith.constant 0 : index
    %1 = vector.load %arg2[%c0_1, %c0_2] : memref<64x16xf32, #tpu.memory_space<vmem>>, vector<64x16xf32>
    %cst = arith.constant dense<0.000000e+00> : vector<64x128xf32>
    %2 = tpu.matmul %1, %0, %cst {dimension_numbers = #tpu.dot_dimension_numbers<[1], [1], [0], [0], [0, 0, 1, 0], [], []>} : vector<64x16xf32>, vector<128x16xf32>, vector<64x128xf32> -> vector<64x128xf32>
    %c0_3 = arith.constant 0 : index
    %c0_4 = arith.constant 0 : index
    %3 = vector.load %arg3[%c0_3, %c0_4] : memref<64x1xf32, #tpu.memory_space<vmem>>, vector<64x1xf32>
    %4 = vector.broadcast %3 : vector<64x1xf32> to vector<64x128xf32>
    %5 = arith.addf %2, %4 : vector<64x128xf32>
    %cst_5 = arith.constant 0.000000e+00 : f32
    %6 = vector.broadcast %cst_5 : f32 to vector<64x128xf32>
    %7 = arith.maximumf %5, %6 : vector<64x128xf32>
    %c0_6 = arith.constant 0 : index
    %c0_7 = arith.constant 0 : index
    %8 = vector.load %arg4[%c0_6, %c0_7] : memref<64x64xf32, #tpu.memory_space<vmem>>, vector<64x64xf32>
    %cst_8 = arith.constant dense<0.000000e+00> : vector<64x128xf32>
    %9 = tpu.matmul %8, %7, %cst_8 {dimension_numbers = #tpu.dot_dimension_numbers<[1], [0], [0], [1], [0, 0, 1, 1], [], []>} : vector<64x64xf32>, vector<64x128xf32>, vector<64x128xf32> -> vector<64x128xf32>
    %c0_9 = arith.constant 0 : index
    %c0_10 = arith.constant 0 : index
    %10 = vector.load %arg5[%c0_9, %c0_10] : memref<64x1xf32, #tpu.memory_space<vmem>>, vector<64x1xf32>
    %11 = vector.broadcast %10 : vector<64x1xf32> to vector<64x128xf32>
    %12 = arith.addf %9, %11 : vector<64x128xf32>
    %cst_11 = arith.constant 0.000000e+00 : f32
    %13 = vector.broadcast %cst_11 : f32 to vector<64x128xf32>
    %14 = arith.maximumf %12, %13 : vector<64x128xf32>
    %c0_12 = arith.constant 0 : index
    %c0_13 = arith.constant 0 : index
    %15 = vector.load %arg6[%c0_12, %c0_13] : memref<4x64xf32, #tpu.memory_space<vmem>>, vector<4x64xf32>
    %cst_14 = arith.constant dense<0.000000e+00> : vector<4x128xf32>
    %16 = tpu.matmul %15, %14, %cst_14 {dimension_numbers = #tpu.dot_dimension_numbers<[1], [0], [0], [1], [0, 0, 1, 1], [], []>} : vector<4x64xf32>, vector<64x128xf32>, vector<4x128xf32> -> vector<4x128xf32>
    %c0_15 = arith.constant 0 : index
    %c0_16 = arith.constant 0 : index
    %17 = vector.load %arg7[%c0_15, %c0_16] : memref<4x1xf32, #tpu.memory_space<vmem>>, vector<4x1xf32>
    %18 = vector.broadcast %17 : vector<4x1xf32> to vector<4x128xf32>
    %19 = arith.addf %16, %18 : vector<4x128xf32>
    %20 = math.tanh %19 : vector<4x128xf32>
    %c0_17 = arith.constant 0 : index
    %c0_18 = arith.constant 0 : index
    %21 = vector.load %arg8[%c0_17, %c0_18] : memref<4x128xf32, #tpu.memory_space<vmem>>, vector<4x128xf32>
    tpu.vector_store %arg8[%c0_17, %c0_18], %20 {strides = array<i32>} : memref<4x128xf32, #tpu.memory_space<vmem>>, vector<4x128xf32>,
    return
  }
  func.func @transform_0(%arg0: i32) -> (i32, i32) {
    %c0_i32 = arith.constant 0 : i32
    %c0_i32_0 = arith.constant 0 : i32
    return %arg0, %c0_i32 : i32, i32
  }
  func.func @transform_1(%arg0: i32) -> (i32, i32) {
    %c0_i32 = arith.constant 0 : i32
    %c0_i32_0 = arith.constant 0 : i32
    %c0_i32_1 = arith.constant 0 : i32
    return %c0_i32, %c0_i32_0 : i32, i32
  }
  func.func @transform_2(%arg0: i32) -> (i32, i32) {
    %c0_i32 = arith.constant 0 : i32
    %c0_i32_0 = arith.constant 0 : i32
    %c0_i32_1 = arith.constant 0 : i32
    return %c0_i32, %c0_i32_0 : i32, i32
  }
  func.func @transform_3(%arg0: i32) -> (i32, i32) {
    %c0_i32 = arith.constant 0 : i32
    %c0_i32_0 = arith.constant 0 : i32
    %c0_i32_1 = arith.constant 0 : i32
    return %c0_i32, %c0_i32_0 : i32, i32
  }
  func.func @transform_4(%arg0: i32) -> (i32, i32) {
    %c0_i32 = arith.constant 0 : i32
    %c0_i32_0 = arith.constant 0 : i32
    %c0_i32_1 = arith.constant 0 : i32
    return %c0_i32, %c0_i32_0 : i32, i32
  }
  func.func @transform_5(%arg0: i32) -> (i32, i32) {
    %c0_i32 = arith.constant 0 : i32
    %c0_i32_0 = arith.constant 0 : i32
    %c0_i32_1 = arith.constant 0 : i32
    return %c0_i32, %c0_i32_0 : i32, i32
  }
  func.func @transform_6(%arg0: i32) -> (i32, i32) {
    %c0_i32 = arith.constant 0 : i32
    %c0_i32_0 = arith.constant 0 : i32
    %c0_i32_1 = arith.constant 0 : i32
    return %c0_i32, %c0_i32_0 : i32, i32
  }
  func.func @transform_7(%arg0: i32) -> (i32, i32) {
    %c0_i32 = arith.constant 0 : i32
    %c0_i32_0 = arith.constant 0 : i32
    return %c0_i32, %arg0 : i32, i32
  }
}

</mosaic_0001>

<bundles_post_ra>
// kernel: tpu_custom_call.1
= control target key start
LH: loop header
LB: loop body
LE: loop exit
PB: predicated region body
PF: predicated region fallthrough
CT: control target
= control target key end

     0   :  { %vm99_vm0 = vcmask 130048   ;;  %v778_v2 = vmov 0   ;;  %s1024_s0 = inlined_call_operand.vmem [shape: f32[8,16], index: 0, kind: input, shape index: {}]   ;;  %s1025_s1 = inlined_call_operand.vmem [shape: f32[64,16], index: 1, kind: input, shape index: {}]   ;;  %s1026_s2 = inlined_call_operand.vmem [shape: f32[64,1], index: 2, kind: input, shape index: {}]   ;;  %s1027_s3 = inlined_call_operand.vmem [shape: f32[64,64], index: 3, kind: input, shape index: {}]   ;;  %s1028_s4 = inlined_call_operand.vmem [shape: f32[64,1], index: 4, kind: input, shape index: {}]   ;;  %s1029_s5 = inlined_call_operand.vmem [shape: f32[4,64], index: 5, kind: input, shape index: {}]   ;;  %s1030_s6 = inlined_call_operand.vmem [shape: f32[4,1], index: 6, kind: input, shape index: {}]   ;;  %s1031_s7 = inlined_call_operand.hbm [shape: f32[4,8], index: 7, kind: output, shape index: {}]  }
   0x1   :  { %v42_v0 = vld [vmem:[%s1024_s0 + $0x78] sm:$0xff]  ;;  %v41_v1 = vld [vmem:[%s1024_s0 + $0x70] sm:$0xff]  ;;  %752 = vset.pattern.permute.xlu0 %v778_v2  ;;  %753 = vset.pattern.permute.xlu1 %v778_v2  ;;  %v40_v3 = vld [vmem:[%s1024_s0 + $0x68] sm:$0xff] }
   0x2   :  { %657 = vmatprep.subr.msk.mxu0 %vm99_vm0, %v42_v0  ;;  %v43_v4 = vld [vmem:[%s1025_s1] sm:$0xff]  ;;  %v58_v6 = vld [vmem:[%s1026_s2 + $0x38] sm:$0xff]  ;;  %v56_v7 = vld [vmem:[%s1026_s2 + $0x28] sm:$0xff] }
   0x3   :  { %658 = vmatpush3.xpose.msk.msra.mxu0 %vm99_vm0, %v42_v0  ;;  %689 = vmatprep.mubr.msk.f32.mxu0 %vm99_vm0, %v43_v4  ;;  %v39_v5 = vld [vmem:[%s1024_s0 + $0x60] sm:$0xff]  ;;  %v57_v8 = vld [vmem:[%s1026_s2 + $0x30] sm:$0xff]  ;;  %v38_v10 = vld [vmem:[%s1024_s0 + $0x58] sm:$0xff] }
   0x4   :  { %659 = vmatprep.subr.msk.mxu0 %vm99_vm0, %v41_v1  ;;  %96 = vperm.xlu0 %752, %v58_v6   ;;  %v55_v9 = vld [vmem:[%s1026_s2 + $0x20] sm:$0xff] }
   0x5   :  { %86 = vperm.xlu1 %753, %v56_v7  }
   0x7   :  { %660 = vmatpush3.xpose.msk.msra.mxu0 %vm99_vm0, %v41_v1 }
   0x8   :  { %661 = vmatprep.subr.msk.mxu0 %vm99_vm0, %v40_v3  ;;  %91 = vperm.xlu0 %752, %v57_v8  }
   0x9   :  { %81 = vperm.xlu1 %753, %v55_v9  }
   0xb   :  { %662 = vmatpush3.xpose.msk.msra.mxu0 %vm99_vm0, %v40_v3 }
   0xc   :  { %663 = vmatprep.subr.msk.mxu0 %vm99_vm0, %v39_v5 }
   0xd   :  { %12 = vsyncpa [#allocation3], 0  ;;  %v54_v11 = vld [vmem:[%s1026_s2 + $0x18] sm:$0xff]  ;;  %v53_v12 = vld [vmem:[%s1026_s2 + $0x10] sm:$0xff]  ;;  %vm341_vm1 = vcmask 523264   ;;  %vm780_vm2 = vmmov 0  }
   0xe   :  { %v37_v13 = vld [vmem:[%s1024_s0 + $0x50] sm:$0xff]  ;;  %76 = vperm.xlu0 %752, %v54_v11   ;;  %71 = vperm.xlu1 %753, %v53_v12   ;;  %v52_v14 = vld [vmem:[%s1026_s2 + $0x8] sm:$0xff]  ;;  %v51_v15 = vld [vmem:[%s1026_s2] sm:$0xff]  ;;  %s781_s22 = smov [#allocation2]  }
   0xf   :  { %664 = vmatpush3.xpose.msk.msra.mxu0 %vm99_vm0, %v39_v5  ;;  %v36_v16 = vld [vmem:[%s1024_s0 + $0x48] sm:$0xff]  ;;  %v300_v17 = vld [vmem:[%s1028_s4 + $0x38] sm:$0xff]  ;;  %v299_v18 = vld [vmem:[%s1028_s4 + $0x30] sm:$0xff]  ;;  %s567_s23 = sshll.u32 %s781_s22, 4  ;;  %s568_s23 = int_to_ptr.vmem [resolvable:$true] %s567_s23 }
  0x10   :  { %665 = vmatprep.subr.msk.mxu0 %vm99_vm0, %v38_v10  ;;  %v35_v19 = vld [vmem:[%s1024_s0 + $0x40] sm:$0xff]  ;;  %v298_v20 = vld [vmem:[%s1028_s4 + $0x28] sm:$0xff]  ;;  %v34_v22 = vld [vmem:[%s1024_s0 + $0x38] sm:$0xff]  ;;  %p761_p1 = scmp.lt.s32.totalorder %s568_s23, %s568_s23 }
  0x11   :  { %v297_v21 = vld [vmem:[%s1028_s4 + $0x20] sm:$0xff]  ;;  %v296_v23 = vld [vmem:[%s1028_s4 + $0x18] sm:$0xff]  ;;  %v295_v24 = vld [vmem:[%s1028_s4 + $0x10] sm:$0xff] }
  0x12   :  { %66 = vperm.xlu0 %752, %v52_v14   ;;  %61 = vperm.xlu1 %753, %v51_v15   ;;  %v33_v25 = vld [vmem:[%s1024_s0 + $0x30] sm:$0xff]  ;;  %v294_v26 = vld [vmem:[%s1028_s4 + $0x8] sm:$0xff]  ;;  %v293_v27 = vld [vmem:[%s1028_s4] sm:$0xff] }
  0x13   :  { %666 = vmatpush3.xpose.msk.msra.mxu0 %vm99_vm0, %v38_v10  ;;  %v32_v28 = vld [vmem:[%s1024_s0 + $0x28] sm:$0xff]  ;;  %v480_v29 = vld [vmem:[%s1030_s6] sm:$0xf]  ;;  %v30_v31 = vld [vmem:[%s1024_s0 + $0x18] sm:$0xff] }
  0x14   :  { %667 = vmatprep.subr.msk.mxu0 %vm99_vm0, %v37_v13  ;;  %v31_v30 = vld [vmem:[%s1024_s0 + $0x20] sm:$0xff]  ;;  %v29_v32 = vld [vmem:[%s1024_s0 + $0x10] sm:$0xff]  ;;  %v28_v33 = vld [vmem:[%s1024_s0 + $0x8] sm:$0xff] }
  0x15   :  { %v27_v34 = vld [vmem:[%s1024_s0] sm:$0xff]  ;;  %v44_v35 = vld [vmem:[%s1025_s1 + $0x8] sm:$0xff]  ;;  %v45_v36 = vld [vmem:[%s1025_s1 + $0x10] sm:$0xff]  ;;  %s756_s0 = scalar_lea.vmem %s568_s23, 64 }
  0x16   :  { %338 = vperm.xlu0 %752, %v300_v17   ;;  %333 = vperm.xlu1 %753, %v299_v18   ;;  %v46_v37 = vld [vmem:[%s1025_s1 + $0x18] sm:$0xff]  ;;  %v47_v38 = vld [vmem:[%s1025_s1 + $0x20] sm:$0xff]  ;;  %v48_v39 = vld [vmem:[%s1025_s1 + $0x28] sm:$0xff]  ;;  %v779_v18 = vmov 0.0   ;;  %p757_p0 = scmp.ne.s32.totalorder %s568_s23, %s756_s0  ;;  %p762_p2 = scmp.lt.s32.totalorder %s756_s0, %s756_s0 }
  0x17   :  { %668 = vmatpush3.xpose.msk.msra.mxu0 %vm99_vm0, %v37_v13  ;;  %v49_v40 = vld [vmem:[%s1025_s1 + $0x30] sm:$0xff]  ;;  %v50_v41 = vld [vmem:[%s1025_s1 + $0x38] sm:$0xff]  ;;  %v285_v42 = vld [vmem:[%s1027_s3] sm:$0xff] }
  0x18   :  { %669 = vmatprep.subr.msk.mxu0 %vm99_vm0, %v36_v16  ;;  %717 = vmatprep.mubr.msk.f32.mxu1 %vm341_vm1, %v285_v42  ;;  %v286_v11 = vld [vmem:[%s1027_s3 + $0x8] sm:$0xff]  ;;  %v287_v12 = vld [vmem:[%s1027_s3 + $0x10] sm:$0xff]  ;;  %v288_v13 = vld [vmem:[%s1027_s3 + $0x18] sm:$0xff]  ;;  %p763_p3 = por %p762_p2, %p761_p1 }
  0x19   :  { %v289_v14 = vld [vmem:[%s1027_s3 + $0x20] sm:$0xff]  ;;  %v290_v15 = vld [vmem:[%s1027_s3 + $0x28] sm:$0xff]  ;;  %v292_v17 = vld [vmem:[%s1027_s3 + $0x38] sm:$0xff] }
  0x1a   :  { %328 = vperm.xlu0 %752, %v298_v20   ;;  %323 = vperm.xlu1 %753, %v297_v21   ;;  %p764_p4 = pnand %p763_p3, %p757_p0 }
  0x1b   :  { %670 = vmatpush3.xpose.msk.msra.mxu0 %vm99_vm0, %v36_v16  ;;  %v291_v16 = vld [vmem:[%s1027_s3 + $0x30] sm:$0xff] }
  0x1c   :  { %671 = vmatprep.subr.msk.mxu0 %vm99_vm0, %v35_v19 }
  0x1e   :  { %318 = vperm.xlu0 %752, %v296_v23   ;;  %313 = vperm.xlu1 %753, %v295_v24  }
  0x1f   :  { %672 = vmatpush3.xpose.msk.msra.mxu0 %vm99_vm0, %v35_v19 }
  0x20   :  { %673 = vmatprep.subr.msk.mxu0 %vm99_vm0, %v34_v22 }
  0x22   :  { %308 = vperm.xlu0 %752, %v294_v26   ;;  %303 = vperm.xlu1 %753, %v293_v27  }
  0x23   :  { %674 = vmatpush3.xpose.msk.msra.mxu0 %vm99_vm0, %v34_v22 }
  0x24   :  { %675 = vmatprep.subr.msk.mxu0 %vm99_vm0, %v33_v25 }
  0x26   :  { %483 = vperm.xlu0 %752, %v480_v29  }
  0x27   :  { %676 = vmatpush3.xpose.msk.msra.mxu0 %vm99_vm0, %v33_v25 }
  0x28   :  { %677 = vmatprep.subr.msk.mxu0 %vm99_vm0, %v32_v28 }
  0x2b   :  { %678 = vmatpush3.xpose.msk.msra.mxu0 %vm99_vm0, %v32_v28 }
  0x2c   :  { %679 = vmatprep.subr.msk.mxu0 %vm99_vm0, %v31_v30 }
  0x2f   :  { %680 = vmatpush3.xpose.msk.msra.mxu0 %vm99_vm0, %v31_v30 }
  0x30   :  { %681 = vmatprep.subr.msk.mxu0 %vm99_vm0, %v30_v31 }
  0x33   :  { %682 = vmatpush3.xpose.msk.msra.mxu0 %vm99_vm0, %v30_v31 }
  0x34   :  { %683 = vmatprep.subr.msk.mxu0 %vm99_vm0, %v29_v32 }
  0x37   :  { %684 = vmatpush3.xpose.msk.msra.mxu0 %vm99_vm0, %v29_v32 }
  0x38   :  { %685 = vmatprep.subr.msk.mxu0 %vm99_vm0, %v28_v33 }
  0x3b   :  { %686 = vmatpush3.xpose.msk.msra.mxu0 %vm99_vm0, %v28_v33 }
  0x3c   :  { %687 = vmatprep.subr.msk.mxu0 %vm99_vm0, %v27_v34 }
  0x3f   :  { %688 = vmatpush3.xpose.msk.msra.mxu0 %vm99_vm0, %v27_v34 }
  0x42   :  { %690 = vmatmul.mubr.msk.f32.vlgmr.msra.gmra.mxu0 %vm99_vm0, %v44_v35 }
  0x43   :  { %692 = vmatprep.mubr.msk.f32.mxu0 %vm99_vm0, %v45_v36 }
  0x46   :  { %693 = vmatmul.mubr.msk.f32.gmra.mxu0 %vm99_vm0, %v46_v37 }
  0x47   :  { %695 = vmatprep.mubr.msk.f32.mxu0 %vm99_vm0, %v47_v38 }
  0x4a   :  { %696 = vmatmul.mubr.msk.f32.gmra.mxu0 %vm99_vm0, %v48_v39 }
  0x4b   :  { %698 = vmatprep.mubr.msk.f32.mxu0 %vm99_vm0, %v49_v40 }
  0x4e   :  { %699 = vmatmul.mubr.msk.f32.gmra.mxu0 %vm99_vm0, %v50_v41 }
  0x7f   :  { %v97_v45 = vpop.permute.xlu0 %96 }
  0x80   :  { %v87_v47 = vpop.permute.xlu1 %86 }
  0x83   :  { %v92_v50 = vpop.permute.xlu0 %91 }
  0x84   :  { %v82_v52 = vpop.permute.xlu1 %81 }
  0x89   :  { %v77_v59 = vpop.permute.xlu0 %76  ;;  %v72_v62 = vpop.permute.xlu1 %71 }
  0x8d   :  { %v67_v3 = vpop.permute.xlu0 %66  ;;  %v62_v6 = vpop.permute.xlu1 %61 }
  0x91   :  { %v339_v21 = vpop.permute.xlu0 %338  ;;  %v334_v23 = vpop.permute.xlu1 %333 }
  0x95   :  { %v329_v26 = vpop.permute.xlu0 %328  ;;  %v324_v28 = vpop.permute.xlu1 %323 }
  0x99   :  { %v319_v35 = vpop.permute.xlu0 %318  ;;  %v314_v38 = vpop.permute.xlu1 %313 }
 0x102   :  { %v691_v43 = vpop.f32.mrf.mxu0 }
 0x103   :  { %v244_v4 = vadd.f32 %v691_v43, %v67_v3  ;;  %v309_v43 = vpop.permute.xlu0 %308 }
 0x104   :  { %v238_v44 = vpop.f32.mrf.mxu0 }
 0x105   :  { %v239_v7 = vadd.f32 %v238_v44, %v62_v6  ;;  %v278_v9 = vmax.f32 %v244_v4, 0.0 }
 0x106   :  { %v694_v46 = vpop.f32.mrf.mxu0 }
 0x107   :  { %v254_v63 = vadd.f32 %v694_v46, %v77_v59  ;;  %v277_v10 = vmax.f32 %v239_v7, 0.0  ;;  %v304_v46 = vpop.permute.xlu1 %303 }
 0x108   :  { %v248_v48 = vpop.f32.mrf.mxu0 }
 0x109   :  { %v249_v1 = vadd.f32 %v248_v48, %v72_v62  ;;  %v280_v5 = vmax.f32 %v254_v63, 0.0 }
 0x10a   :  { %v697_v49 = vpop.f32.mrf.mxu0 }
 0x10b   :  { %v264_v56 = vadd.f32 %v697_v49, %v87_v47  ;;  %v279_v8 = vmax.f32 %v249_v1, 0.0 }
 0x10c   :  { %v258_v51 = vpop.f32.mrf.mxu0 }
 0x10d   :  { %v259_v60 = vadd.f32 %v258_v51, %v82_v52  ;;  %v282_v0 = vmax.f32 %v264_v56, 0.0  ;;  %v479_v51 = vld [vmem:[%s1029_s5] sm:$0xf]  ;;  %v484_v52 = vpop.permute.xlu0 %483 }
 0x10e   :  { %v700_v53 = vpop.f32.mrf.mxu0 }
 0x10f   :  { %v274_v54 = vadd.f32 %v700_v53, %v97_v45  ;;  %v281_v2 = vmax.f32 %v259_v60, 0.0 }
 0x110   :  { %v268_v55 = vpop.f32.mrf.mxu0 }
 0x111   :  { %v284_v57 = vmax.f32 %v274_v54, 0.0  ;;  %v269_v58 = vadd.f32 %v268_v55, %v92_v50 }
 0x113   :  { %v283_v61 = vmax.f32 %v269_v58, 0.0  ;;  %701 = vmatprep.subr.mxu1 %v284_v57 }
 0x114   :  { %702 = vmatpush3.msra.mxu1 %v284_v57 }
 0x115   :  { %703 = vmatprep.subr.mxu1 %v283_v61 }
 0x116   :  { %704 = vmatpush3.msra.mxu1 %v283_v61 }
 0x117   :  { %705 = vmatprep.subr.mxu1 %v282_v0 }
 0x118   :  { %706 = vmatpush3.msra.mxu1 %v282_v0 }
 0x119   :  { %707 = vmatprep.subr.mxu1 %v281_v2 }
 0x11a   :  { %708 = vmatpush3.msra.mxu1 %v281_v2 }
 0x11b   :  { %709 = vmatprep.subr.mxu1 %v280_v5 }
 0x11c   :  { %710 = vmatpush3.msra.mxu1 %v280_v5 }
 0x11d   :  { %711 = vmatprep.subr.mxu1 %v279_v8 }
 0x11e   :  { %712 = vmatpush3.msra.mxu1 %v279_v8 }
 0x11f   :  { %713 = vmatprep.subr.mxu1 %v278_v9 }
 0x120   :  { %714 = vmatpush3.msra.mxu1 %v278_v9 }
 0x121   :  { %715 = vmatprep.subr.mxu1 %v277_v10 }
 0x122   :  { %716 = vmatpush3.msra.mxu1 %v277_v10 }
 0x123   :  { %718 = vmatmul.mubr.msk.f32.vlgmr.msra.gmra.mxu1 %vm341_vm1, %v286_v11  ;;  %729 = vmatprep.subr.mxu1 %v779_v18 }
 0x124   :  { %720 = vmatprep.mubr.msk.f32.mxu1 %vm341_vm1, %v287_v12 }
 0x127   :  { %721 = vmatmul.mubr.msk.f32.gmra.mxu1 %vm341_vm1, %v288_v13 }
 0x128   :  { %723 = vmatprep.mubr.msk.f32.mxu1 %vm341_vm1, %v289_v14 }
 0x12b   :  { %724 = vmatmul.mubr.msk.f32.gmra.mxu1 %vm341_vm1, %v290_v15 }
 0x12c   :  { %726 = vmatprep.mubr.msk.f32.mxu1 %vm341_vm1, %v291_v16 }
 0x12f   :  { %727 = vmatmul.mubr.msk.f32.gmra.mxu1 %vm341_vm1, %v292_v17 }
 0x130   :  { %745 = vmatprep.mubr.msk.f32.mxu1 %vm780_vm2, %v779_v18 }
 0x1e3   :  { %v719_v19 = vpop.f32.mrf.mxu1 }
 0x1e4   :  { %v438_v44 = vadd.f32 %v719_v19, %v309_v43 }
 0x1e5   :  { %v432_v20 = vpop.f32.mrf.mxu1 }
 0x1e6   :  { %v433_v47 = vadd.f32 %v432_v20, %v304_v46  ;;  %v472_v49 = vmax.f32 %v438_v44, 0.0 }
 0x1e7   :  { %v722_v22 = vpop.f32.mrf.mxu1 }
 0x1e8   :  { %v448_v39 = vadd.f32 %v722_v22, %v319_v35  ;;  %v471_v50 = vmax.f32 %v433_v47, 0.0 }
 0x1e9   :  { %v442_v24 = vpop.f32.mrf.mxu1 }
 0x1ea   :  { %v443_v41 = vadd.f32 %v442_v24, %v314_v38  ;;  %v474_v45 = vmax.f32 %v448_v39, 0.0 }
 0x1eb   :  { %v725_v25 = vpop.f32.mrf.mxu1 }
 0x1ec   :  { %v458_v32 = vadd.f32 %v725_v25, %v329_v26  ;;  %v473_v48 = vmax.f32 %v443_v41, 0.0 }
 0x1ed   :  { %v452_v27 = vpop.f32.mrf.mxu1 }
 0x1ee   :  { %v453_v36 = vadd.f32 %v452_v27, %v324_v28  ;;  %v476_v40 = vmax.f32 %v458_v32, 0.0 }
 0x1ef   :  { %v728_v29 = vpop.f32.mrf.mxu1 }
 0x1f0   :  { %v468_v30 = vadd.f32 %v728_v29, %v339_v21  ;;  %v475_v42 = vmax.f32 %v453_v36, 0.0 }
 0x1f1   :  { %v462_v31 = vpop.f32.mrf.mxu1 }
 0x1f2   :  { %v478_v33 = vmax.f32 %v468_v30, 0.0  ;;  %v463_v34 = vadd.f32 %v462_v31, %v334_v23 }
 0x1f4   :  { %v477_v37 = vmax.f32 %v463_v34, 0.0  ;;  %730 = vmatpush3.msra.mxu1 %v478_v33 }
 0x1f5   :  { %731 = vmatprep.subr.mxu1 %v779_v18 }
 0x1f6   :  { %732 = vmatpush3.msra.mxu1 %v477_v37 }
 0x1f7   :  { %733 = vmatprep.subr.mxu1 %v779_v18 }
 0x1f8   :  { %734 = vmatpush3.msra.mxu1 %v476_v40 }
 0x1f9   :  { %735 = vmatprep.subr.mxu1 %v779_v18 }
 0x1fa   :  { %736 = vmatpush3.msra.mxu1 %v475_v42 }
 0x1fb   :  { %737 = vmatprep.subr.mxu1 %v779_v18 }
 0x1fc   :  { %738 = vmatpush3.msra.mxu1 %v474_v45 }
 0x1fd   :  { %739 = vmatprep.subr.mxu1 %v779_v18 }
 0x1fe   :  { %740 = vmatpush3.msra.mxu1 %v473_v48 }
 0x1ff   :  { %741 = vmatprep.subr.mxu1 %v779_v18 }
 0x200   :  { %742 = vmatpush3.msra.mxu1 %v472_v49 }
 0x201   :  { %743 = vmatprep.subr.mxu1 %v779_v18 }
 0x202   :  { %744 = vmatpush3.msra.mxu1 %v471_v50 }
 0x203   :  { %746 = vmatmul.mubr.msk.f32.vlgmr.msra.gmra.mxu1 %vm341_vm1, %v479_v51 }
 0x2c3   :  { %v555_v53 = vpop.f32.mrf.mxu1 }
 0x2c4   :  { %v556_v54 = vadd.f32 %v555_v53, %v484_v52 }
 0x2c5   :  { %v747_v55 = vpop.f32.mrf.mxu1 }
 0x2c6   :  { %754 = vtanh.f32 %v556_v54 }
 0x2d3   :  { %v755_v56 = vpop.eup %754 }
 0x2d4   :  { %560 = vst [vmem:[#allocation2] sm:$0xf] %v755_v56 }
 0x2d5   :  { %767 = shalt.err (!%p764_p4)
}
 0x2d6   :  { %570 = dma.vmem_to_hbm [thread:$0]  %s568_s23, 64, %s1031_s7, [#allocation3]  }
 0x2d7   :  { %776 = dma.done.wait [#allocation3], 64  }
 0x2d8   :  { %777 = vsyncadd [#allocation3], 4294967232 }
 0x2d9   :  { %574 = vsyncpa [#allocation3], 1 }

</bundles_post_ra>
